<compile_context>
chip_gen: v5e
topology: v5e:2x2
jax: 0.10.0
libtpu: 0.0.40
codegen_flags: <defaults>
</compile_context>

<pallas_src>
import jax
import jax.numpy as jnp
import numpy as np
from jax import lax
from jax.experimental import pallas as pl
from jax.experimental.pallas import tpu as pltpu

MARGIN = 0.3
TEMPERATURE = 0.07
INV_TEMP = 1.0 / TEMPERATURE
EPS = 1e-8


def multitask_loss_kernel(feat_ref, side_ref, out_ref):
    # feat_ref: (2B, D) = [emb1; emb2], native dtype (fed straight to the MXU).
    # side_ref: (2B, 4+G) f32, columns:
    #   0: labels (only rows [0, B) meaningful)
    #   1: age_pred   stacked [age1; age2]
    #   2: age_diff   duplicated [age_diff; age_diff]
    #   3: gender lbl stacked [gl1; gl2]   (f32 carrier; exact for |label| < 2^24)
    #   4:4+G: gender logits stacked [gp1; gp2]
    feats_raw = feat_ref[...]
    feats = feats_raw.astype(jnp.float32)
    side = side_ref[...]

    twoB = feats.shape[0]
    B = twoB // 2
    G = side.shape[1] - 4

    labels = side[:B, 0:1]
    age_all = side[:, 1:2]
    aged = side[:, 2:3]
    gl = side[:, 3:4].astype(jnp.int32)
    gp = side[:, 4:4 + G]

    # ---- squared norms: computed once, reused for cosine denom AND InfoNCE diag ----
    nsq = jnp.sum(feats * feats, axis=-1, keepdims=True)          # (2B, 1)
    n1sq = nsq[:B]
    n2sq = nsq[B:]

    # ---- contrastive (cosine-similarity margin) term ----
    emb1 = feats[:B]
    emb2 = feats[B:]
    dot = jnp.sum(emb1 * emb2, axis=-1, keepdims=True)            # (B, 1)
    # max(||x||, eps) per factor == rsqrt(max(||x||^2, eps^2)); EUP rsqrt, overflow-safe.
    inv_norm = lax.rsqrt(jnp.maximum(n1sq, EPS * EPS)) * \
        lax.rsqrt(jnp.maximum(n2sq, EPS * EPS))
    sim = dot * inv_norm
    contrastive = labels * (1.0 - sim) ** 2 + \
        (1.0 - labels) * jnp.maximum(sim - MARGIN, 0.0) ** 2
    contrastive_mean = jnp.sum(contrastive) * (1.0 / B)

    # ---- InfoNCE term ----
    # torch builds logits = [diag, off-diag] per row with target class 0; CE is
    # permutation-invariant within a row -> lse(row/T) - diag/T, and diag(F @ F.T) == nsq
    # (same values feed dot_general, so diag and the matmul stay consistent).
    sim_matrix = lax.dot_general(
        feats_raw, feats_raw,
        dimension_numbers=(((1,), (1,)), ((), ())),                # F . F^T, no transpose
        preferred_element_type=jnp.float32)                        # (2B, 2B) f32 accum
    logits = sim_matrix * INV_TEMP
    diag = nsq * INV_TEMP
    m = jnp.max(logits, axis=-1, keepdims=True)
    lse = m + jnp.log(jnp.sum(jnp.exp(logits - m), axis=-1, keepdims=True))
    infonce = jnp.sum(lse - diag) * (1.0 / twoB)

    loss = contrastive_mean + 0.5 * infonce

    # ---- age MSE (mean) single pass: mse(age1,d) + mse(age2,d) == sum over 2B / B ----
    age_loss = jnp.sum((age_all - aged) ** 2) * (1.0 / B)
    loss = loss + 0.1 * age_loss

    # ---- gender CE (mean, int targets) single pass: ce(gp1,gl1)+ce(gp2,gl2) == sum/B --
    m_g = jnp.max(gp, axis=-1, keepdims=True)
    lse_g = m_g + jnp.log(jnp.sum(jnp.exp(gp - m_g), axis=-1, keepdims=True))
    col = lax.broadcasted_iota(jnp.int32, gp.shape, 1)
    picked = jnp.sum(jnp.where(col == gl, gp, 0.0), axis=-1, keepdims=True)
    gender_loss = jnp.sum(lse_g - picked) * (1.0 / B)
    loss = loss + 0.1 * gender_loss

    out_ref[...] = jnp.full((1, 1), loss, dtype=jnp.float32)


def multitask_loss(emb1, emb2, labels, age1, age2, age_diff, gp1, gp2, gl1, gl2):
    B = emb1.shape[0]
    f32 = jnp.float32

    # One (2B, D) features DMA (native dtype).
    features = jnp.concatenate([emb1, emb2], axis=0)

    # One packed (2B, 4+G) f32 side DMA.  With allow_input_fusion these concats/casts
    # fuse into the pallas_call input instead of materializing in HBM.
    top = jnp.concatenate([labels.astype(f32).reshape(B, 1),
                           age1.astype(f32).reshape(B, 1),
                           age_diff.astype(f32).reshape(B, 1),
                           gl1.astype(f32).reshape(B, 1),
                           gp1.astype(f32)], axis=1)
    bot = jnp.concatenate([labels.astype(f32).reshape(B, 1),
                           age2.astype(f32).reshape(B, 1),
                           age_diff.astype(f32).reshape(B, 1),
                           gl2.astype(f32).reshape(B, 1),
                           gp2.astype(f32)], axis=1)
    side = jnp.concatenate([top, bot], axis=0)

    out = pl.pallas_call(
        multitask_loss_kernel,
        out_shape=jax.ShapeDtypeStruct((1, 1), jnp.float32),
        in_specs=[pl.BlockSpec(memory_space=pltpu.MemorySpace.VMEM)] * 2,
        out_specs=pl.BlockSpec(memory_space=pltpu.MemorySpace.VMEM),
        compiler_params=pltpu.CompilerParams(
            allow_input_fusion=[True, True]),
    )(features, side)
    return out[0, 0]


def reference_loss(emb1, emb2, labels, age1, age2, age_diff, gp1, gp2, gl1, gl2):
    """Pure-numpy reference faithful to the PyTorch code (mask/column reordering included)."""
    emb1 = np.asarray(emb1, np.float64)
    emb2 = np.asarray(emb2, np.float64)
    labels = np.asarray(labels, np.float64).reshape(-1)
    B = emb1.shape[0]

    n1 = np.maximum(np.linalg.norm(emb1, axis=-1), EPS)
    n2 = np.maximum(np.linalg.norm(emb2, axis=-1), EPS)
    sim = np.sum(emb1 * emb2, axis=-1) / (n1 * n2)
    contrastive = labels * (1 - sim) ** 2 + (1 - labels) * np.maximum(sim - MARGIN, 0.0) ** 2

    feats = np.concatenate([emb1, emb2], axis=0)
    sm = feats @ feats.T
    mask = np.eye(2 * B, dtype=bool)
    pos = sm[mask].reshape(2 * B, 1)
    neg = sm[~mask].reshape(2 * B, -1)
    logits = np.concatenate([pos, neg], axis=1) / TEMPERATURE
    m = logits.max(axis=1, keepdims=True)
    lse = m[:, 0] + np.log(np.exp(logits - m).sum(axis=1))
    infonce = np.mean(lse - logits[:, 0])

    loss = contrastive.mean() + 0.5 * infonce

    age1 = np.asarray(age1, np.float64)
    age2 = np.asarray(age2, np.float64)
    aged = np.asarray(age_diff, np.float64)
    age_loss = np.mean((age1 - aged) ** 2) + np.mean((age2 - aged) ** 2)
    loss = loss + 0.1 * age_loss

    def ce(gp, gl):
        gp = np.asarray(gp, np.float64)
        gl = np.asarray(gl).reshape(-1)
        m_g = gp.max(axis=1, keepdims=True)
        lse_g = m_g[:, 0] + np.log(np.exp(gp - m_g).sum(axis=1))
        picked = gp[np.arange(gp.shape[0]), gl]
        return np.mean(lse_g - picked)

    loss = loss + 0.1 * (ce(gp1, gl1) + ce(gp2, gl2))
    return loss


if __name__ == "__main__":
    B, D, G = 8, 128, 2
    key = jax.random.PRNGKey(0)
    ks = jax.random.split(key, 8)

    # InsightFace-style embeddings are unit-norm; also keeps logits/T well-conditioned.
    def unit(x):
        return x / jnp.linalg.norm(x, axis=-1, keepdims=True)

    emb1 = unit(jax.random.normal(ks[0], (B, D), jnp.float32))
    emb2 = unit(jax.random.normal(ks[1], (B, D), jnp.float32))
    labels = jax.random.bernoulli(ks[2], 0.5, (B, 1)).astype(jnp.float32)
    age1 = jax.random.normal(ks[3], (B, 1), jnp.float32)
    age2 = jax.random.normal(ks[4], (B, 1), jnp.float32)
    age_diff = jax.random.normal(ks[5], (B, 1), jnp.float32)
    gp1 = jax.random.normal(ks[6], (B, G), jnp.float32)
    gp2 = jax.random.normal(ks[7], (B, G), jnp.float32)
    gl1 = jnp.array([0, 1, 0, 1, 0, 1, 0, 1], jnp.int32).reshape(B, 1)
    gl2 = jnp.array([1, 0, 1, 0, 1, 0, 1, 0], jnp.int32).reshape(B, 1)

    # Run under jit so the side-packing concats and the final [0,0] slice are part of the
    # same program as the pallas_call (no extra dispatches).
    loss_fn = jax.jit(multitask_loss)
    loss = loss_fn(emb1, emb2, labels, age1, age2, age_diff, gp1, gp2, gl1, gl2)
    loss = jax.block_until_ready(loss)

    ref = reference_loss(emb1, emb2, labels, age1, age2, age_diff, gp1, gp2, gl1, gl2)
    rel_err = abs(float(loss) - float(ref)) / max(1.0, abs(float(ref)))
    assert rel_err < 2e-3, f"mismatch: kernel={float(loss)} ref={float(ref)} rel_err={rel_err}"

    print("KERNEL_OK")
</pallas_src>

<mosaic_0001>
module attributes {stable_mosaic.version = 11 : i64} {
  func.func @multitask_loss_kernel(%arg0: memref<16x128xf32, #tpu.memory_space<vmem>>, %arg1: memref<16x6xf32, #tpu.memory_space<vmem>>, %arg2: memref<1x1xf32, #tpu.memory_space<vmem>>) attributes {dimension_semantics = [], scalar_prefetch = 0 : i64, scratch_operands = 0 : i64, tpu.core_type = #tpu.core_type<tc>} {
    %c0 = arith.constant 0 : index
    %c0_0 = arith.constant 0 : index
    %0 = vector.load %arg0[%c0, %c0_0] : memref<16x128xf32, #tpu.memory_space<vmem>>, vector<16x128xf32>
    %c0_1 = arith.constant 0 : index
    %c0_2 = arith.constant 0 : index
    %1 = vector.load %arg1[%c0_1, %c0_2] : memref<16x6xf32, #tpu.memory_space<vmem>>, vector<16x6xf32>
    %2 = vector.extract_strided_slice %1 {offsets = [0, 0], sizes = [8, 1], strides = [1, 1]} : vector<16x6xf32> to vector<8x1xf32>
    %3 = vector.extract_strided_slice %1 {offsets = [0, 1], sizes = [16, 1], strides = [1, 1]} : vector<16x6xf32> to vector<16x1xf32>
    %4 = vector.extract_strided_slice %1 {offsets = [0, 2], sizes = [16, 1], strides = [1, 1]} : vector<16x6xf32> to vector<16x1xf32>
    %5 = vector.extract_strided_slice %1 {offsets = [0, 3], sizes = [16, 1], strides = [1, 1]} : vector<16x6xf32> to vector<16x1xf32>
    %6 = arith.fptosi %5 : vector<16x1xf32> to vector<16x1xi32>
    %7 = vector.extract_strided_slice %1 {offsets = [0, 4], sizes = [16, 2], strides = [1, 1]} : vector<16x6xf32> to vector<16x2xf32>
    %8 = arith.mulf %0, %0 : vector<16x128xf32>
    %cst = arith.constant dense<0.000000e+00> : vector<16xf32>
    %9 = vector.multi_reduction <add>, %8, %cst [1] : vector<16x128xf32> to vector<16xf32>
    %10 = vector.shape_cast %9 : vector<16xf32> to vector<16x1xf32>
    %11 = vector.extract_strided_slice %10 {offsets = [0, 0], sizes = [8, 1], strides = [1, 1]} : vector<16x1xf32> to vector<8x1xf32>
    %12 = vector.extract_strided_slice %10 {offsets = [8, 0], sizes = [8, 1], strides = [1, 1]} : vector<16x1xf32> to vector<8x1xf32>
    %13 = vector.extract_strided_slice %0 {offsets = [0, 0], sizes = [8, 128], strides = [1, 1]} : vector<16x128xf32> to vector<8x128xf32>
    %14 = vector.extract_strided_slice %0 {offsets = [8, 0], sizes = [8, 128], strides = [1, 1]} : vector<16x128xf32> to vector<8x128xf32>
    %15 = arith.mulf %13, %14 : vector<8x128xf32>
    %cst_3 = arith.constant dense<0.000000e+00> : vector<8xf32>
    %16 = vector.multi_reduction <add>, %15, %cst_3 [1] : vector<8x128xf32> to vector<8xf32>
    %17 = vector.shape_cast %16 : vector<8xf32> to vector<8x1xf32>
    %cst_4 = arith.constant 1.000000e-16 : f32
    %18 = vector.broadcast %cst_4 : f32 to vector<8x1xf32>
    %19 = arith.maximumf %11, %18 : vector<8x1xf32>
    %20 = math.rsqrt %19 : vector<8x1xf32>
    %cst_5 = arith.constant 1.000000e-16 : f32
    %21 = vector.broadcast %cst_5 : f32 to vector<8x1xf32>
    %22 = arith.maximumf %12, %21 : vector<8x1xf32>
    %23 = math.rsqrt %22 : vector<8x1xf32>
    %24 = arith.mulf %20, %23 : vector<8x1xf32>
    %25 = arith.mulf %17, %24 : vector<8x1xf32>
    %cst_6 = arith.constant 1.000000e+00 : f32
    %26 = vector.broadcast %cst_6 : f32 to vector<8x1xf32>
    %27 = arith.subf %26, %25 : vector<8x1xf32>
    %28 = arith.mulf %27, %27 : vector<8x1xf32>
    %29 = arith.mulf %2, %28 : vector<8x1xf32>
    %cst_7 = arith.constant 1.000000e+00 : f32
    %30 = vector.broadcast %cst_7 : f32 to vector<8x1xf32>
    %31 = arith.subf %30, %2 : vector<8x1xf32>
    %cst_8 = arith.constant 3.000000e-01 : f32
    %32 = vector.broadcast %cst_8 : f32 to vector<8x1xf32>
    %33 = arith.subf %25, %32 : vector<8x1xf32>
    %cst_9 = arith.constant 0.000000e+00 : f32
    %34 = vector.broadcast %cst_9 : f32 to vector<8x1xf32>
    %35 = arith.maximumf %33, %34 : vector<8x1xf32>
    %36 = arith.mulf %35, %35 : vector<8x1xf32>
    %37 = arith.mulf %31, %36 : vector<8x1xf32>
    %38 = arith.addf %29, %37 : vector<8x1xf32>
    %39 = vector.shape_cast %38 : vector<8x1xf32> to vector<1x8x1xf32>
    %cst_10 = arith.constant dense<0.000000e+00> : vector<1xf32>
    %40 = vector.multi_reduction <add>, %39, %cst_10 [1, 2] : vector<1x8x1xf32> to vector<1xf32>
    %41 = vector.shape_cast %40 : vector<1xf32> to vector<1x1x1xf32>
    %42 = vector.extract %41[0, 0, 0] : f32 from vector<1x1x1xf32>
    %cst_11 = arith.constant 1.250000e-01 : f32
    %43 = arith.mulf %42, %cst_11 : f32
    %cst_12 = arith.constant dense<0.000000e+00> : vector<16x16xf32>
    %44 = tpu.matmul %0, %0, %cst_12 {dimension_numbers = #tpu.dot_dimension_numbers<[1], [1], [0], [0], [0, 0, 1, 0], [], []>} : vector<16x128xf32>, vector<16x128xf32>, vector<16x16xf32> -> vector<16x16xf32>
    %cst_13 = arith.constant 14.2857141 : f32
    %45 = vector.broadcast %cst_13 : f32 to vector<16x16xf32>
    %46 = arith.mulf %44, %45 : vector<16x16xf32>
    %cst_14 = arith.constant 14.2857141 : f32
    %47 = vector.broadcast %cst_14 : f32 to vector<16x1xf32>
    %48 = arith.mulf %10, %47 : vector<16x1xf32>
    %cst_15 = arith.constant dense<0xFF800000> : vector<16xf32>
    %49 = vector.multi_reduction <maximumf>, %46, %cst_15 [1] : vector<16x16xf32> to vector<16xf32>
    %50 = vector.shape_cast %49 : vector<16xf32> to vector<16x1xf32>
    %51 = vector.broadcast %50 : vector<16x1xf32> to vector<16x16xf32>
    %52 = arith.subf %46, %51 : vector<16x16xf32>
    %53 = math.exp %52 : vector<16x16xf32>
    %cst_16 = arith.constant dense<0.000000e+00> : vector<16xf32>
    %54 = vector.multi_reduction <add>, %53, %cst_16 [1] : vector<16x16xf32> to vector<16xf32>
    %55 = vector.shape_cast %54 : vector<16xf32> to vector<16x1xf32>
    %56 = math.log %55 : vector<16x1xf32>
    %57 = arith.addf %50, %56 : vector<16x1xf32>
    %58 = arith.subf %57, %48 : vector<16x1xf32>
    %59 = vector.shape_cast %58 : vector<16x1xf32> to vector<1x16x1xf32>
    %cst_17 = arith.constant dense<0.000000e+00> : vector<1xf32>
    %60 = vector.multi_reduction <add>, %59, %cst_17 [1, 2] : vector<1x16x1xf32> to vector<1xf32>
    %61 = vector.shape_cast %60 : vector<1xf32> to vector<1x1x1xf32>
    %62 = vector.extract %61[0, 0, 0] : f32 from vector<1x1x1xf32>
    %cst_18 = arith.constant 6.250000e-02 : f32
    %63 = arith.mulf %62, %cst_18 : f32
    %cst_19 = arith.constant 5.000000e-01 : f32
    %64 = arith.mulf %cst_19, %63 : f32
    %65 = arith.addf %43, %64 : f32
    %66 = arith.subf %3, %4 : vector<16x1xf32>
    %67 = arith.mulf %66, %66 : vector<16x1xf32>
    %68 = vector.shape_cast %67 : vector<16x1xf32> to vector<1x16x1xf32>
    %cst_20 = arith.constant dense<0.000000e+00> : vector<1xf32>
    %69 = vector.multi_reduction <add>, %68, %cst_20 [1, 2] : vector<1x16x1xf32> to vector<1xf32>
    %70 = vector.shape_cast %69 : vector<1xf32> to vector<1x1x1xf32>
    %71 = vector.extract %70[0, 0, 0] : f32 from vector<1x1x1xf32>
    %cst_21 = arith.constant 1.250000e-01 : f32
    %72 = arith.mulf %71, %cst_21 : f32
    %cst_22 = arith.constant 1.000000e-01 : f32
    %73 = arith.mulf %cst_22, %72 : f32
    %74 = arith.addf %65, %73 : f32
    %cst_23 = arith.constant dense<0xFF800000> : vector<16xf32>
    %75 = vector.multi_reduction <maximumf>, %7, %cst_23 [1] : vector<16x2xf32> to vector<16xf32>
    %76 = vector.shape_cast %75 : vector<16xf32> to vector<16x1xf32>
    %77 = vector.broadcast %76 : vector<16x1xf32> to vector<16x2xf32>
    %78 = arith.subf %7, %77 : vector<16x2xf32>
    %79 = math.exp %78 : vector<16x2xf32>
    %cst_24 = arith.constant dense<0.000000e+00> : vector<16xf32>
    %80 = vector.multi_reduction <add>, %79, %cst_24 [1] : vector<16x2xf32> to vector<16xf32>
    %81 = vector.shape_cast %80 : vector<16xf32> to vector<16x1xf32>
    %82 = math.log %81 : vector<16x1xf32>
    %83 = arith.addf %76, %82 : vector<16x1xf32>
    %84 = tpu.iota {dimensions = array<i32: 1>} : vector<16x2xi32>
    %85 = vector.broadcast %6 : vector<16x1xi32> to vector<16x2xi32>
    %86 = arith.cmpi eq, %84, %85 : vector<16x2xi32>
    %cst_25 = arith.constant 0.000000e+00 : f32
    %87 = vector.broadcast %cst_25 : f32 to vector<16x2xf32>
    %88 = arith.select %86, %7, %87 : vector<16x2xi1>, vector<16x2xf32>
    %cst_26 = arith.constant dense<0.000000e+00> : vector<16xf32>
    %89 = vector.multi_reduction <add>, %88, %cst_26 [1] : vector<16x2xf32> to vector<16xf32>
    %90 = vector.shape_cast %89 : vector<16xf32> to vector<16x1xf32>
    %91 = arith.subf %83, %90 : vector<16x1xf32>
    %92 = vector.shape_cast %91 : vector<16x1xf32> to vector<1x16x1xf32>
    %cst_27 = arith.constant dense<0.000000e+00> : vector<1xf32>
    %93 = vector.multi_reduction <add>, %92, %cst_27 [1, 2] : vector<1x16x1xf32> to vector<1xf32>
    %94 = vector.shape_cast %93 : vector<1xf32> to vector<1x1x1xf32>
    %95 = vector.extract %94[0, 0, 0] : f32 from vector<1x1x1xf32>
    %cst_28 = arith.constant 1.250000e-01 : f32
    %96 = arith.mulf %95, %cst_28 : f32
    %cst_29 = arith.constant 1.000000e-01 : f32
    %97 = arith.mulf %cst_29, %96 : f32
    %98 = arith.addf %74, %97 : f32
    %99 = vector.broadcast %98 : f32 to vector<1x1xf32>
    %c0_30 = arith.constant 0 : index
    %c0_31 = arith.constant 0 : index
    %100 = vector.load %arg2[%c0_30, %c0_31] : memref<1x1xf32, #tpu.memory_space<vmem>>, vector<1x1xf32>
    tpu.vector_store %arg2[%c0_30, %c0_31], %99 {strides = array<i32>} : memref<1x1xf32, #tpu.memory_space<vmem>>, vector<1x1xf32>,
    return
  }
}

</mosaic_0001>

<bundles_post_ra>
// kernel: multitask_loss.2
= control target key start
LH: loop header
LB: loop body
LE: loop exit
PB: predicated region body
PF: predicated region fallthrough
CT: control target
= control target key end

     0   :  { %s604_s0 = inlined_call_operand.vmem [shape: f32[8,128], index: 0, kind: input, shape index: {}]   ;;  %s605_s1 = inlined_call_operand.<no memory space> [shape: f32[], index: 1, kind: input, shape index: {}]   ;;  %s606_s2 = inlined_call_operand.vmem [shape: f32[8,128], index: 2, kind: input, shape index: {}]   ;;  %s607_s3 = inlined_call_operand.vmem [shape: f32[8,6], index: 3, kind: input, shape index: {}]   ;;  %s608_s4 = inlined_call_operand.vmem [shape: f32[8,6], index: 4, kind: input, shape index: {}]   ;;  %s609_s5 = inlined_call_operand.hbm [shape: f32[1,1], index: 5, kind: output, shape index: {}]  }
   0x1   :  { %v10_v0 = vstv %s605_s1 }
   0x2   :  { %v80_v1 = vld [vmem:[%s604_s0] sm:$0xff]  ;;  %v102_v3 = vlaneseq }
   0x3   :  { %v81_v2 = vld [vmem:[%s606_s2] sm:$0xff]  ;;  %v513_v4 = vmax.f32 %v10_v0, %v80_v1 }
   0x4   :  { %14 = vsyncpa [#allocation23], 0  ;;  %v101_v5 = vld [vmem:[%s608_s4] sm:$0xff]  ;;  %v518_v6 = vand.u32 127, %v102_v3  ;;  %v521_v7 = vmax.f32 %v81_v2, %v10_v0  ;;  %vm291_vm1 = vcmask 48160   ;;  %s470_s2 = smov 127  }
   0x5   :  { %201 = vmatpush.xpose.msra.mxu0 %v513_v4  ;;  %398 = vmatpush.xpose.msra.mxu1 %v513_v4  ;;  %v100_v8 = vld [vmem:[%s607_s3] sm:$0xff]  ;;  %s471_s3 = smov 124   ;;  %v472_v15 = vmov 3   ;;  %vm214_vm2 = vcmask 130048   ;;  %v134_v39 = vmul.f32 %v513_v4, %v513_v4  ;;  %vm312_vm5 = vcmask 15360   ;;  %s473_s11 = smov [#allocation22]  }
   0x6   :  { %vm105_vm0 = vcmp.lt.s32.totalorder %v518_v6, 6  ;;  %422 = vset.pattern.permute.xlu2 %v472_v15  ;;  %423 = vset.pattern.permute.xlu0 %v472_v15  ;;  %v133_v38 = vmul.f32 %v521_v7, %v521_v7  ;;  %v139_v40 = vmul.f32 %v513_v4, %v521_v7  ;;  %vm175_vm14 = vcmask 7168   ;;  %s374_s12 = sshll.u32 %s473_s11, 4  ;;  %s376_s15 = sshll.u32 %s609_s5, 4  ;;  %s375_s12 = int_to_ptr.vmem [resolvable:$true] %s374_s12  ;;  %s377_s15 = int_to_ptr.hbm [resolvable:$true] %s376_s15 }
   0x7   :  { %v106_v9 = vsel %vm105_vm0, %v101_v5, %v10_v0  ;;  %v118_v11 = vsel %vm105_vm0, %v100_v8, %v10_v0  ;;  %vm367_vm15 = vcmask 0  }
   0x8   :  { %v528_v10 = vmax.f32 %v106_v9, %v10_v0  ;;  %v534_v13 = vmax.f32 %v10_v0, %v118_v11 }
   0x9   :  { %202 = vmatpush.xpose.msra.mxu0 %v521_v7  ;;  %399 = vmatpush.xpose.msra.mxu1 %v521_v7 }
   0xa   :  { %v292_v12 = vsel %vm291_vm1, %v528_v10, -inf  ;;  %v295_v14 = vsel %vm291_vm1, %v534_v13, -inf  ;;  %v401_v28 = vceil.f32 %v528_v10  ;;  %v402_v29 = vfloor.f32 %v528_v10 }
   0xb   :  { %293 = vmax.xlane.f32.xlu0 %v292_v12  ;;  %vm400_vm3 = vcmp.lt.s32.totalorder %v528_v10, 0  ;;  %v406_v34 = vceil.f32 %v534_v13  ;;  %v407_v35 = vfloor.f32 %v534_v13  ;;  %vm405_vm4 = vcmp.lt.s32.totalorder %v534_v13, 0 }
   0xc   :  { %203 = vmatmul.f32.vlgmr.msra.gmra.mxu0 %v521_v7  ;;  %206 = vmatmul.f32.vlgmr.msra.gmra.mxu1 %v513_v4  ;;  %v403_v32 = vsel %vm400_vm3, %v401_v28, %v402_v29 }
   0xd   :  { %v404_v33 = vcvt.f32.s32 %v403_v32  ;;  %v408_v36 = vsel %vm405_vm4, %v406_v34, %v407_v35 }
   0xe   :  { %v409_v37 = vcvt.f32.s32 %v408_v36 }
  0x13   :  { %296 = vmax.xlane.f32.xlu0 %v295_v14 }
  0x27   :  { %258 = vrot.lane.b32.xlu0 %v528_v10, %s470_s2 }
  0x2f   :  { %337 = vrot.lane.b32.xlu0 %v534_v13, %s471_s3 }
  0x7e   :  { %v542_v16 = vpop.xlane.xlu0 %293 }
  0x7f   :  { %v298_v17 = vsub.f32 %v528_v10, %v542_v16 }
  0x81   :  { %v300_v18 = vmul.f32 1.442695, %v298_v17 }
  0x83   :  { %424 = vpow2.f32 %v300_v18 }
  0x86   :  { %v546_v19 = vpop.xlane.xlu0 %296 }
  0x87   :  { %v299_v20 = vsub.f32 %v534_v13, %v546_v19 }
  0x89   :  { %v425_v21 = vpop.eup %424  ;;  %v302_v22 = vmul.f32 1.442695, %v299_v20  ;;  %v204_v23 = vpop.f32.mrf.mxu0 }
  0x8a   :  { %v210_v24 = vmul.f32 14.285714, %v204_v23  ;;  %306 = vrot.lane.b32.xlu2 %v425_v21, %s471_s3  ;;  %v207_v25 = vpop.f32.mrf.mxu1 }
  0x8b   :  { %426 = vpow2.f32 %v302_v22  ;;  %v211_v27 = vmul.f32 14.285714, %v207_v25 }
  0x8c   :  { %v215_v26 = vsel %vm214_vm2, %v210_v24, -inf }
  0x8d   :  { %216 = vmax.xlane.f32.xlu1 %v215_v26  ;;  %v218_v31 = vsel %vm214_vm2, %v211_v27, -inf }
  0x91   :  { %v427_v30 = vpop.eup %426 }
  0x92   :  { %308 = vrot.lane.b32.xlu2 %v427_v30, %s471_s3 }
  0x95   :  { %219 = vmax.xlane.f32.xlu1 %v218_v31 }
  0x99   :  { %v259_v56 = vpop.permute.xlu0 %258 }
  0x9a   :  { %328 = vperm.xlu2 %422, %v404_v33   ;;  %v264_v3 = vsub.f32 %v528_v10, %v259_v56  ;;  %v169_v33 = vsub.f32 1.0, %v528_v10 }
  0x9c   :  { %v266_v4 = vmul.f32 %v264_v3, %v264_v3 }
  0xa1   :  { %v338_v61 = vpop.permute.xlu0 %337 }
  0xa2   :  { %331 = vperm.xlu2 %422, %v409_v37  }
  0xaa   :  { %335 = vrot.lane.b32.xlu2 %v528_v10, %s471_s3 }
  0xae   :  { %260 = vrot.lane.b32.xlu1 %v534_v13, %s470_s2 }
  0xd3   :  { %135 = vadd.xlane.f32.xlu2 %v133_v38 }
  0xd8   :  { %137 = vadd.xlane.f32.xlu1 %v134_v39 }
  0xe0   :  { %140 = vadd.xlane.f32.xlu1 %v139_v40 }
  0xe4   :  { %v307_v41 = vpop.permute.xlu2 %306 }
  0xe5   :  { %v313_v59 = vsel %vm312_vm5, %v307_v41, 0.0 }
  0xec   :  { %v309_v42 = vpop.permute.xlu2 %308 }
  0xed   :  { %v316_v43 = vsel %vm312_vm5, %v309_v42, 0.0 }
  0xee   :  { %317 = vadd.xlane.f32.xlu2 %v316_v43 }
  0xf4   :  { %v329_v44 = vpop.permute.xlu2 %328 }
  0xf5   :  { %vm333_vm6 = vcmp.eq.s32.totalorder %v518_v6, %v329_v44 }
  0xfc   :  { %v332_v45 = vpop.permute.xlu2 %331 }
  0xfd   :  { %vm334_vm7 = vcmp.eq.s32.totalorder %v518_v6, %v332_v45 }
  0xfe   :  { %v342_v62 = vsel %vm334_vm7, %v338_v61, 0.0 }
  0xff   :  { %v346_v63 = vsel %vm312_vm5, %v342_v62, 0.0 }
 0x100   :  { %v571_v46 = vpop.xlane.xlu1 %216 }
 0x101   :  { %v221_v47 = vsub.f32 %v210_v24, %v571_v46 }
 0x103   :  { %v223_v48 = vmul.f32 1.442695, %v221_v47 }
 0x104   :  { %v336_v49 = vpop.permute.xlu2 %335 }
 0x105   :  { %428 = vpow2.f32 %v223_v48  ;;  %v341_v50 = vsel %vm333_vm6, %v336_v49, 0.0 }
 0x106   :  { %v343_v51 = vsel %vm312_vm5, %v341_v50, 0.0 }
 0x107   :  { %344 = vadd.xlane.f32.xlu1 %v343_v51 }
 0x108   :  { %v576_v52 = vpop.xlane.xlu1 %219 }
 0x109   :  { %v222_v53 = vsub.f32 %v211_v27, %v576_v52 }
 0x10b   :  { %v429_v54 = vpop.eup %428  ;;  %v225_v55 = vmul.f32 1.442695, %v222_v53 }
 0x10c   :  { %v227_v57 = vsel %vm214_vm2, %v429_v54, 0.0 }
 0x10d   :  { %430 = vpow2.f32 %v225_v55  ;;  %228 = vadd.xlane.f32.xlu0 %v227_v57 }
 0x113   :  { %v431_v58 = vpop.eup %430 }
 0x114   :  { %v230_v60 = vsel %vm214_vm2, %v431_v58, 0.0 }
 0x115   :  { %314 = vadd.xlane.f32.xlu0 %v313_v59  ;;  %231 = vadd.xlane.f32.xlu2 %v230_v60 }
 0x11d   :  { %347 = vadd.xlane.f32.xlu0 %v346_v63 }
 0x120   :  { %v261_v0 = vpop.permute.xlu1 %260 }
 0x121   :  { %v265_v1 = vsub.f32 %v534_v13, %v261_v0 }
 0x123   :  { %v267_v2 = vmul.f32 %v265_v1, %v265_v1 }
 0x125   :  { %272 = vrot.lane.b32.xlu1 %v267_v2, %s470_s2 }
 0x12d   :  { %270 = vrot.lane.b32.xlu2 %v266_v4, %s470_s2 }
 0x146   :  { %v136_v5 = vpop.xlane.xlu2 %135 }
 0x147   :  { %v142_v7 = vmax.f32 %v136_v5, 1e-16  ;;  %v212_v54 = vmul.f32 14.285714, %v136_v5 }
 0x149   :  { %432 = vrsqrt.f32 %v142_v7  ;;  %vm149_vm8 = vweird.f32 %v142_v7 }
 0x14b   :  { %v138_v6 = vpop.xlane.xlu1 %137 }
 0x14c   :  { %v153_v8 = vmax.f32 %v138_v6, 1e-16  ;;  %v213_v59 = vmul.f32 14.285714, %v138_v6 }
 0x14e   :  { %434 = vrsqrt.f32 %v153_v8  ;;  %vm160_vm10 = vweird.f32 %v153_v8 }
 0x14f   :  { %v433_v9 = vpop.eup %432 }
 0x150   :  { %v144_v11 = vmul.f32 %v433_v9, %v142_v7  ;;  %vm150_vm9 = vweird.f32 %v433_v9 }
 0x151   :  { %vm151_vm12 = vmor %vm149_vm8, %vm150_vm9 }
 0x152   :  { %v145_v12 = vmul.f32 %v433_v9, %v144_v11 }
 0x153   :  { %v141_v26 = vpop.xlane.xlu1 %140 }
 0x154   :  { %v435_v14 = vpop.eup %434  ;;  %v146_v15 = vmul.f32 0.5, %v145_v12 }
 0x155   :  { %v155_v13 = vmul.f32 %v435_v14, %v153_v8  ;;  %vm161_vm11 = vweird.f32 %v435_v14 }
 0x156   :  { %v147_v17 = vsub.f32 1.5, %v146_v15  ;;  %vm162_vm13 = vmor %vm160_vm10, %vm161_vm11 }
 0x157   :  { %v156_v18 = vmul.f32 %v435_v14, %v155_v13 }
 0x158   :  { %v148_v21 = vmul.f32 %v433_v9, %v147_v17 }
 0x159   :  { %v157_v20 = vmul.f32 0.5, %v156_v18 }
 0x15a   :  { %v152_v23 = vsel %vm151_vm12, %v433_v9, %v148_v21 }
 0x15b   :  { %v158_v22 = vsub.f32 1.5, %v157_v20 }
 0x15d   :  { %v159_v24 = vmul.f32 %v435_v14, %v158_v22 }
 0x15f   :  { %v163_v25 = vsel %vm162_vm13, %v435_v14, %v159_v24 }
 0x160   :  { %v164_v27 = vmul.f32 %v163_v25, %v152_v23 }
 0x161   :  { %v318_v39 = vpop.xlane.xlu2 %317 }
 0x162   :  { %v165_v28 = vmul.f32 %v164_v27, %v141_v26 }
 0x164   :  { %v166_v29 = vsub.f32 1.0, %v165_v28  ;;  %v397_v30 = vadd.f32 -0.3, %v165_v28 }
 0x166   :  { %v167_v31 = vmul.f32 %v166_v29, %v166_v29  ;;  %v171_v32 = vmax.f32 %v397_v30, 0.0 }
 0x168   :  { %v172_v34 = vmul.f32 %v171_v32, %v171_v32  ;;  %v168_v35 = vmul.f32 %v167_v31, %v528_v10 }
 0x16a   :  { %v173_v36 = vmul.f32 %v172_v34, %v169_v33 }
 0x16c   :  { %v174_v37 = vadd.f32 %v173_v36, %v168_v35 }
 0x16e   :  { %v176_v38 = vsel %vm175_vm14, %v174_v37, 0.0 }
 0x16f   :  { %177 = vadd.xlane.f32.xlu0 %v176_v38 }
 0x17a   :  { %v345_v56 = vpop.xlane.xlu1 %344 }
 0x180   :  { %v229_v40 = vpop.xlane.xlu0 %228 }
 0x181   :  { %436 = vlog2.f32 %v229_v40 }
 0x182   :  { %438 = vlog2.f32 %v318_v39 }
 0x187   :  { %v437_v41 = vpop.eup %436 }
 0x188   :  { %v315_v42 = vpop.xlane.xlu0 %314  ;;  %v232_v43 = vpop.xlane.xlu2 %231  ;;  %v234_v45 = vmul.f32 0.6931472, %v437_v41 }
 0x189   :  { %v439_v44 = vpop.eup %438  ;;  %440 = vlog2.f32 %v315_v42 }
 0x18a   :  { %442 = vlog2.f32 %v232_v43  ;;  %v322_v47 = vmul.f32 0.6931472, %v439_v44  ;;  %v237_v10 = vadd.f32 %v234_v45, %v571_v46 }
 0x18c   :  { %v324_v51 = vadd.f32 %v322_v47, %v546_v19  ;;  %v239_v61 = vsub.f32 %v237_v10, %v212_v54 }
 0x18e   :  { %v241_v1 = vsel %vm175_vm14, %v239_v61, 0.0 }
 0x18f   :  { %v441_v48 = vpop.eup %440 }
 0x190   :  { %v443_v49 = vpop.eup %442  ;;  %v320_v50 = vmul.f32 0.6931472, %v441_v48  ;;  %v348_v53 = vpop.xlane.xlu0 %347 }
 0x191   :  { %v236_v55 = vmul.f32 0.6931472, %v443_v49  ;;  %v350_v58 = vsub.f32 %v324_v51, %v348_v53 }
 0x192   :  { %v323_v57 = vadd.f32 %v320_v50, %v542_v16  ;;  %v271_v16 = vpop.permute.xlu2 %270 }
 0x193   :  { %v238_v60 = vadd.f32 %v236_v55, %v576_v52  ;;  %v352_v46 = vsel %vm175_vm14, %v350_v58, 0.0  ;;  %v276_v52 = vsel %vm175_vm14, %v271_v16, 0.0 }
 0x194   :  { %v349_v62 = vsub.f32 %v323_v57, %v345_v56 }
 0x195   :  { %v240_v63 = vsub.f32 %v238_v60, %v213_v59 }
 0x196   :  { %v351_v0 = vsel %vm175_vm14, %v349_v62, 0.0 }
 0x197   :  { %v242_v19 = vsel %vm175_vm14, %v240_v63, 0.0  ;;  %v353_v2 = vadd.f32 %v352_v46, %v351_v0  ;;  %v273_v4 = vpop.permute.xlu1 %272 }
 0x198   :  { %v243_v3 = vadd.f32 %v242_v19, %v241_v1  ;;  %v277_v5 = vsel %vm175_vm14, %v273_v4, 0.0 }
 0x199   :  { %354 = vadd.xlane.f32.xlu2 %v353_v2  ;;  %v278_v7 = vadd.f32 %v277_v5, %v276_v52 }
 0x19a   :  { %244 = vadd.xlane.f32.xlu0 %v243_v3 }
 0x1a2   :  { %279 = vadd.xlane.f32.xlu0 %v278_v7 }
 0x1e2   :  { %v178_v6 = vpop.xlane.xlu0 %177 }
 0x1e3   :  { %v179_v8 = vrot.slane %v178_v6, 4 }
 0x1e5   :  { %v180_v9 = vadd.f32 %v179_v8, %v178_v6 }
 0x1e7   :  { %v181_v11 = vrot.slane %v180_v9, 2 }
 0x1e9   :  { %v182_v12 = vadd.f32 %v181_v11, %v180_v9 }
 0x1eb   :  { %v183_v14 = vrot.slane %v182_v12, 1 }
 0x1ed   :  { %v184_v15 = vadd.f32 %v183_v14, %v182_v12 }
 0x1ef   :  { %410 = vpush %v184_v15 }
 0x20c   :  { %v355_v13 = vpop.xlane.xlu2 %354 }
 0x20d   :  { %v245_v17 = vpop.xlane.xlu0 %244  ;;  %v356_v18 = vrot.slane %v355_v13, 4 }
 0x20e   :  { %v246_v20 = vrot.slane %v245_v17, 4 }
 0x20f   :  { %v357_v22 = vadd.f32 %v356_v18, %v355_v13 }
 0x210   :  { %v247_v21 = vadd.f32 %v246_v20, %v245_v17 }
 0x211   :  { %v358_v25 = vrot.slane %v357_v22, 2 }
 0x212   :  { %v248_v23 = vrot.slane %v247_v21, 2 }
 0x213   :  { %v359_v31 = vadd.f32 %v358_v25, %v357_v22 }
 0x214   :  { %v249_v24 = vadd.f32 %v248_v23, %v247_v21 }
 0x215   :  { %v280_v26 = vpop.xlane.xlu0 %279  ;;  %v360_v34 = vrot.slane %v359_v31, 1 }
 0x216   :  { %v281_v27 = vrot.slane %v280_v26, 4  ;;  %v250_v28 = vrot.slane %v249_v24, 1 }
 0x217   :  { %v361_v37 = vadd.f32 %v360_v34, %v359_v31 }
 0x218   :  { %v282_v29 = vadd.f32 %v281_v27, %v280_v26  ;;  %v251_v30 = vadd.f32 %v250_v28, %v249_v24 }
 0x21a   :  { %v283_v32 = vrot.slane %v282_v29, 2  ;;  %412 = vpush %v251_v30 }
 0x21c   :  { %v284_v33 = vadd.f32 %v283_v32, %v282_v29 }
 0x21e   :  { %v285_v35 = vrot.slane %v284_v33, 1 }
 0x220   :  { %v286_v36 = vadd.f32 %v285_v35, %v284_v33  ;;  %s411_s4 = spop %410 }
 0x221   :  { %s186_s29 = smul.f32 0.125, %s411_s4 }
 0x222   :  { %414 = vpush %v286_v36 }
 0x223   :  { %416 = vpush %v361_v37 }
 0x24b   :  { %s413_s26 = spop %412 }
 0x24c   :  { %s253_s27 = smul.f32 0.0625, %s413_s26 }
 0x24e   :  { %s254_s28 = smul.f32 0.5, %s253_s27 }
 0x250   :  { %s255_s9 = sadd.f32 %s254_s28, %s186_s29 }
 0x253   :  { %s415_s30 = spop %414 }
 0x254   :  { %s288_s6 = smul.f32 0.125, %s415_s30  ;;  %s417_s7 = spop %416 }
 0x255   :  { %s363_s8 = smul.f32 0.125, %s417_s7 }
 0x256   :  { %s289_s10 = smul.f32 0.1, %s288_s6 }
 0x257   :  { %s364_s17 = smul.f32 0.1, %s363_s8 }
 0x258   :  { %s290_s16 = sadd.f32 %s289_s10, %s255_s9 }
 0x25a   :  { %s365_s18 = sadd.f32 %s364_s17, %s290_s16 }
 0x25c   :  { %v366_v38 = vstv %s365_s18 }
 0x25d   :  { %368 = vst.msk [vmem:[#allocation22] sm:$0x1] %vm367_vm15, %v366_v38 }
 0x25e   :  { %379 = dma.vmem_to_hbm [thread:$0]  %s375_s12, 16, %s377_s15, [#allocation23]  }
 0x25f   :  { %468 = dma.done.wait [#allocation23], 16  }
 0x260   :  { %469 = vsyncadd [#allocation23], 4294967280 }
 0x261   :  { %384 = vsyncpa [#allocation23], 1 }

</bundles_post_ra>
